<compile_context>
chip_gen: v5e
topology: v5e:2x2
jax: 0.10.0
libtpu: 0.0.40
codegen_flags: <defaults>
</compile_context>

<pallas_src>
import jax
import jax.numpy as jnp
import numpy as np
from jax.experimental import pallas as pl
from jax.experimental.pallas import tpu as pltpu

_EPS = 1e-5


def _round_up(x, m):
    return ((x + m - 1) // m) * m


# --------------------------------------------------------------------------------------
# Kernels
# --------------------------------------------------------------------------------------
def _make_stats_kernel(hw, tp):
    """Pass 1: y = W_packed @ x_tile (2C, tp); accumulate per-(batch, channel) sum & sum-of-sq."""
    needs_mask = (hw % tp) != 0

    def kernel(x_ref, w_ref, sum_ref, ssq_ref):
        @pl.when(pl.program_id(1) == 0)
        def _():
            sum_ref[...] = jnp.zeros_like(sum_ref)
            ssq_ref[...] = jnp.zeros_like(ssq_ref)

        y = jnp.dot(w_ref[...], x_ref[0], preferred_element_type=jnp.float32)   # (2C, tp)
        if needs_mask:
            # Tail tile: zero the out-of-range pixel columns (their x data is unspecified).
            valid = hw - pl.program_id(1) * tp
            col = jax.lax.broadcasted_iota(jnp.int32, y.shape, 1)
            y = jnp.where(col < valid, y, 0.0)
        sum_ref[0] += jnp.sum(y, axis=1, keepdims=True)        # lane-axis reduce (XLU slot)
        ssq_ref[0] += jnp.sum(y * y, axis=1, keepdims=True)

    return kernel


def _apply_kernel(x_ref, w_ref, scale_ref, shift_ref, out_ref):
    """Pass 2: y = W_packed @ x_tile; fused BN affine + ReLU; lane-dense store.

    No tail masking needed: out-of-range columns of a partial last block are dropped on store.
    """
    y = jnp.dot(w_ref[...], x_ref[0], preferred_element_type=jnp.float32)       # (2C, tp)
    out_ref[0] = jnp.maximum(y * scale_ref[...] + shift_ref[...], 0.0)


# --------------------------------------------------------------------------------------
# Tile / VMEM sizing
# --------------------------------------------------------------------------------------
def _select_tile_and_vmem(hw, C, w_bufs):
    """Pick the largest 128-multiple pixel tile that fits ~75% of the scoped-VMEM budget."""
    C2 = 2 * C
    try:
        phys = int(pltpu.get_tpu_info().vmem_capacity_bytes)   # 128 MiB v5e/v6e, 64 MiB v7x
    except Exception:
        phys = 64 << 20                                        # conservative (v7x-sized) fallback
    # ~64 MiB scoped on 128-MiB parts (v5e/v6e), ~40 MiB on v7x (64 MiB physical).
    vmem_limit = int(min(64 << 20, max(32 << 20, phys - (24 << 20))))
    budget = (vmem_limit * 3) // 4
    # Per-step footprint (pass 2 dominates; all sized as f32, conservative for bf16 inputs):
    #   x tile   : 2 (double-buffered) * C  * tp * 4 B
    #   out tile : 2 (double-buffered) * 2C * tp * 4 B
    #   weight   : w_bufs * 2C * C * 4 B   (+ tiny scale/shift blocks)
    const_bytes = w_bufs * C2 * C * 4 + 4 * C2 * 4
    per_tp_bytes = (2 * C + 2 * C2) * 4                        # = 24*C bytes per pixel column
    tp = (budget - const_bytes) // per_tp_bytes
    tp = min(tp, 4096, _round_up(hw, 128))
    tp = max(128, (tp // 128) * 128)
    return int(tp), vmem_limit


# --------------------------------------------------------------------------------------
# Wrapper
# --------------------------------------------------------------------------------------
def dpffb_forward(x_nchw, params, compute_dtype=jnp.float32):
    """x_nchw: (N, C, H, W) -> (N, 2C, H, W), training-mode BatchNorm semantics.

    compute_dtype=jnp.bfloat16 halves x/w HBM traffic and doubles MXU rate (statistics and the
    BN/ReLU epilogue stay in f32); the default f32 matches the reference to 1e-5.
    """
    wu, bu, gu, beu, wl, bl, gl, bel = params
    del bu, bl  # conv bias is cancelled exactly by BN mean subtraction -> skip its DMA + add
    N, C, H, W = x_nchw.shape
    HW = H * W
    C2 = 2 * C
    x = x_nchw.reshape(N, C, HW).astype(compute_dtype)   # NCHW-native: pixels on the lane axis

    # Pack both branches into a single weight / affine-parameter set.
    w = jnp.concatenate([wu, wl], axis=0).astype(compute_dtype)                     # (2C, C)
    gamma = jnp.concatenate([gu, gl], axis=0).reshape(C2, 1).astype(jnp.float32)    # (2C, 1)
    beta = jnp.concatenate([beu, bel], axis=0).reshape(C2, 1).astype(jnp.float32)

    # The weight's block index never changes; for large C drop its second (wasted) buffer.
    w_bytes = C2 * C * jnp.dtype(compute_dtype).itemsize
    single_buffer_w = w_bytes >= (2 << 20)
    w_bufs = 1 if single_buffer_w else 2

    tp, vmem_limit = _select_tile_and_vmem(HW, C, w_bufs)
    n_pix = pl.cdiv(HW, tp)
    grid = (N, n_pix)

    x_spec = pl.BlockSpec((1, C, tp), lambda n, p: (n, 0, p))
    if single_buffer_w:
        w_spec = pl.BlockSpec((C2, C), lambda n, p: (0, 0), pipeline_mode=pl.Buffered(1))
    else:
        w_spec = pl.BlockSpec((C2, C), lambda n, p: (0, 0))
    vec_spec = pl.BlockSpec((C2, 1), lambda n, p: (0, 0))
    stat_spec = pl.BlockSpec((1, C2, 1), lambda n, p: (n, 0, 0))

    bytes_x = int(x.size) * x.dtype.itemsize
    bytes_w = int(w.size) * w.dtype.itemsize
    mm_flops = 2 * N * HW * C2 * C

    # ---- Pass 1: per-(batch, channel) sum / sum-of-squares.  Batch axis "parallel" (shards
    #      across v7x's two TensorCores); pixel axis "arbitrary" (resident (1,2C,1) accumulator).
    s_nb, q_nb = pl.pallas_call(
        _make_stats_kernel(HW, tp),
        grid=grid,
        in_specs=[x_spec, w_spec],
        out_specs=[stat_spec, stat_spec],
        out_shape=[jax.ShapeDtypeStruct((N, C2, 1), jnp.float32),
                   jax.ShapeDtypeStruct((N, C2, 1), jnp.float32)],
        compiler_params=pltpu.CompilerParams(
            dimension_semantics=("parallel", "arbitrary"),
            vmem_limit_bytes=vmem_limit),
        cost_estimate=pl.CostEstimate(
            flops=mm_flops + 3 * N * HW * C2, transcendentals=0,
            bytes_accessed=bytes_x + bytes_w + 2 * N * C2 * 4),
    )(x, w)

    # ---- Fold BN statistics + affine params into one scale/shift pair (tiny scalar work).
    cnt = float(N * HW)
    s = jnp.sum(s_nb, axis=0)                             # (2C, 1)
    ssq = jnp.sum(q_nb, axis=0)                           # (2C, 1)
    mean = s / cnt
    # NOTE: E[y^2]-mean^2 can lose precision for very large pixel counts / large |mean|/std;
    # acceptable here and keeps pass 1 to a single sweep over the data.
    var = jnp.maximum(ssq / cnt - mean * mean, 0.0)       # biased variance (BN training mode)
    rstd = jax.lax.rsqrt(var + _EPS)
    scale = gamma * rstd                                  # (2C, 1)
    shift = beta - mean * scale                           # (2C, 1)

    # ---- Pass 2: matmul + fused BN affine + ReLU, lane-dense stores, fully megacore-parallel.
    out = pl.pallas_call(
        _apply_kernel,
        grid=grid,
        in_specs=[x_spec, w_spec, vec_spec, vec_spec],
        out_specs=pl.BlockSpec((1, C2, tp), lambda n, p: (n, 0, p)),
        out_shape=jax.ShapeDtypeStruct((N, C2, HW), jnp.float32),
        compiler_params=pltpu.CompilerParams(
            dimension_semantics=("parallel", "parallel"),
            vmem_limit_bytes=vmem_limit),
        cost_estimate=pl.CostEstimate(
            flops=mm_flops + 3 * N * HW * C2, transcendentals=0,
            bytes_accessed=bytes_x + bytes_w + N * HW * C2 * 4),
    )(x, w, scale, shift)

    return out.reshape(N, C2, H, W)


# --------------------------------------------------------------------------------------
# Plain-JAX reference mirroring the PyTorch forward (training-mode BN, including conv bias)
# --------------------------------------------------------------------------------------
def _reference(x_nchw, params):
    wu, bu, gu, beu, wl, bl, gl, bel = params

    def branch(w, b, g, be):
        y = jnp.einsum('nchw,oc->nohw', x_nchw, w) + b[None, :, None, None]
        mean = jnp.mean(y, axis=(0, 2, 3), keepdims=True)
        var = jnp.mean((y - mean) ** 2, axis=(0, 2, 3), keepdims=True)
        z = (y - mean) / jnp.sqrt(var + _EPS) * g[None, :, None, None] + be[None, :, None, None]
        return jnp.maximum(z, 0.0)

    return jnp.concatenate([branch(wu, bu, gu, beu), branch(wl, bl, gl, bel)], axis=1)


def init_params(key, C):
    ks = jax.random.split(key, 8)
    # Conv2d(C, C, 1) weight in torch is (C_out, C_in, 1, 1) -> stored here as (C_out, C_in).
    wu = jax.random.normal(ks[0], (C, C), jnp.float32) * 0.2
    bu = jax.random.normal(ks[1], (C,), jnp.float32) * 0.1
    gu = 1.0 + 0.1 * jax.random.normal(ks[2], (C,), jnp.float32)
    beu = 0.1 * jax.random.normal(ks[3], (C,), jnp.float32)
    wl = jax.random.normal(ks[4], (C, C), jnp.float32) * 0.2
    bl = jax.random.normal(ks[5], (C,), jnp.float32) * 0.1
    gl = 1.0 + 0.1 * jax.random.normal(ks[6], (C,), jnp.float32)
    bel = 0.1 * jax.random.normal(ks[7], (C,), jnp.float32)
    return (wu, bu, gu, beu, wl, bl, gl, bel)


if __name__ == "__main__":
    key = jax.random.PRNGKey(0)
    k_x, k_p = jax.random.split(key)

    N, C, H, W = 2, 4, 16, 16
    x = jax.random.normal(k_x, (N, C, H, W), jnp.float32)
    params = init_params(k_p, C)

    out = jax.block_until_ready(dpffb_forward(x, params))
    ref = jax.block_until_ready(_reference(x, params))

    assert out.shape == (N, 2 * C, H, W), out.shape
    np.testing.assert_allclose(np.asarray(out), np.asarray(ref), rtol=1e-5, atol=1e-5)

    print("KERNEL_OK")
</pallas_src>

<mosaic_0001>
module attributes {stable_mosaic.version = 11 : i64} {
  func.func @kernel(%arg0: i32, %arg1: i32, %arg2: memref<1x4x256xf32, #tpu.memory_space<vmem>>, %arg3: memref<8x4xf32, #tpu.memory_space<vmem>>, %arg4: memref<1x8x1xf32, #tpu.memory_space<vmem>>, %arg5: memref<1x8x1xf32, #tpu.memory_space<vmem>>) attributes {dimension_semantics = [#tpu.dimension_semantics<parallel>, #tpu.dimension_semantics<arbitrary>], iteration_bounds = array<i64: 2, 1>, scalar_prefetch = 0 : i64, scratch_operands = 0 : i64, tpu.core_type = #tpu.core_type<tc>, window_params = [{transform_indices = @transform_0, window_bounds = array<i64: 1, 4, 256>}, {pipeline_mode = #tpu.pipeline_mode<synchronous>, transform_indices = @transform_1, window_bounds = array<i64: 8, 4>}, {transform_indices = @transform_2, window_bounds = array<i64: 1, 8, 1>}, {transform_indices = @transform_3, window_bounds = array<i64: 1, 8, 1>}]} {
    %c0_i32 = arith.constant 0 : i32
    %0 = arith.cmpi eq, %arg1, %c0_i32 : i32
    %1 = arith.extui %0 : i1 to i32
    %c0_i32_0 = arith.constant 0 : i32
    %2 = arith.cmpi ne, %1, %c0_i32_0 : i32
    scf.if %2 {
      %cst_19 = arith.constant 0.000000e+00 : f32
      %24 = vector.broadcast %cst_19 : f32 to vector<1x8x1xf32>
      %c0_20 = arith.constant 0 : index
      %c0_21 = arith.constant 0 : index
      %c0_22 = arith.constant 0 : index
      %25 = vector.load %arg4[%c0_20, %c0_21, %c0_22] : memref<1x8x1xf32, #tpu.memory_space<vmem>>, vector<1x8x1xf32>
      tpu.vector_store %arg4[%c0_20, %c0_21, %c0_22], %24 {strides = array<i32>} : memref<1x8x1xf32, #tpu.memory_space<vmem>>, vector<1x8x1xf32>,
      %cst_23 = arith.constant 0.000000e+00 : f32
      %26 = vector.broadcast %cst_23 : f32 to vector<1x8x1xf32>
      %c0_24 = arith.constant 0 : index
      %c0_25 = arith.constant 0 : index
      %c0_26 = arith.constant 0 : index
      %27 = vector.load %arg5[%c0_24, %c0_25, %c0_26] : memref<1x8x1xf32, #tpu.memory_space<vmem>>, vector<1x8x1xf32>
      tpu.vector_store %arg5[%c0_24, %c0_25, %c0_26], %26 {strides = array<i32>} : memref<1x8x1xf32, #tpu.memory_space<vmem>>, vector<1x8x1xf32>,
    } else {
    }
    %c0 = arith.constant 0 : index
    %c0_1 = arith.constant 0 : index
    %3 = vector.load %arg3[%c0, %c0_1] : memref<8x4xf32, #tpu.memory_space<vmem>>, vector<8x4xf32>
    %c0_2 = arith.constant 0 : index
    %c0_3 = arith.constant 0 : index
    %c0_4 = arith.constant 0 : index
    %4 = vector.load %arg2[%c0_2, %c0_3, %c0_4] : memref<1x4x256xf32, #tpu.memory_space<vmem>>, vector<1x4x256xf32>
    %5 = vector.shape_cast %4 : vector<1x4x256xf32> to vector<4x256xf32>
    %cst = arith.constant dense<0.000000e+00> : vector<8x256xf32>
    %6 = tpu.matmul %3, %5, %cst {dimension_numbers = #tpu.dot_dimension_numbers<[1], [0], [0], [1], [0, 0, 1, 1], [], []>} : vector<8x4xf32>, vector<4x256xf32>, vector<8x256xf32> -> vector<8x256xf32>
    %c0_5 = arith.constant 0 : index
    %c0_6 = arith.constant 0 : index
    %c0_7 = arith.constant 0 : index
    %7 = vector.load %arg4[%c0_5, %c0_6, %c0_7] : memref<1x8x1xf32, #tpu.memory_space<vmem>>, vector<1x8x1xf32>
    %8 = vector.shape_cast %7 : vector<1x8x1xf32> to vector<8x1xf32>
    %cst_8 = arith.constant dense<0.000000e+00> : vector<8xf32>
    %9 = vector.multi_reduction <add>, %6, %cst_8 [1] : vector<8x256xf32> to vector<8xf32>
    %10 = vector.shape_cast %9 : vector<8xf32> to vector<8x1xf32>
    %11 = arith.addf %8, %10 : vector<8x1xf32>
    %c0_9 = arith.constant 0 : index
    %c0_10 = arith.constant 0 : index
    %c0_11 = arith.constant 0 : index
    %12 = vector.load %arg4[%c0_9, %c0_10, %c0_11] : memref<1x8x1xf32, #tpu.memory_space<vmem>>, vector<1x8x1xf32>
    %13 = vector.shape_cast %12 : vector<1x8x1xf32> to vector<8x1xf32>
    %14 = vector.shape_cast %11 : vector<8x1xf32> to vector<1x8x1xf32>
    tpu.vector_store %arg4[%c0_9, %c0_10, %c0_11], %14 {strides = array<i32>} : memref<1x8x1xf32, #tpu.memory_space<vmem>>, vector<1x8x1xf32>,
    %c0_12 = arith.constant 0 : index
    %c0_13 = arith.constant 0 : index
    %c0_14 = arith.constant 0 : index
    %15 = vector.load %arg5[%c0_12, %c0_13, %c0_14] : memref<1x8x1xf32, #tpu.memory_space<vmem>>, vector<1x8x1xf32>
    %16 = vector.shape_cast %15 : vector<1x8x1xf32> to vector<8x1xf32>
    %17 = arith.mulf %6, %6 : vector<8x256xf32>
    %cst_15 = arith.constant dense<0.000000e+00> : vector<8xf32>
    %18 = vector.multi_reduction <add>, %17, %cst_15 [1] : vector<8x256xf32> to vector<8xf32>
    %19 = vector.shape_cast %18 : vector<8xf32> to vector<8x1xf32>
    %20 = arith.addf %16, %19 : vector<8x1xf32>
    %c0_16 = arith.constant 0 : index
    %c0_17 = arith.constant 0 : index
    %c0_18 = arith.constant 0 : index
    %21 = vector.load %arg5[%c0_16, %c0_17, %c0_18] : memref<1x8x1xf32, #tpu.memory_space<vmem>>, vector<1x8x1xf32>
    %22 = vector.shape_cast %21 : vector<1x8x1xf32> to vector<8x1xf32>
    %23 = vector.shape_cast %20 : vector<8x1xf32> to vector<1x8x1xf32>
    tpu.vector_store %arg5[%c0_16, %c0_17, %c0_18], %23 {strides = array<i32>} : memref<1x8x1xf32, #tpu.memory_space<vmem>>, vector<1x8x1xf32>,
    return
  }
  func.func @transform_0(%arg0: i32, %arg1: i32) -> (i32, i32, i32) {
    %c0_i32 = arith.constant 0 : i32
    %c0_i32_0 = arith.constant 0 : i32
    return %arg0, %c0_i32, %arg1 : i32, i32, i32
  }
  func.func @transform_1(%arg0: i32, %arg1: i32) -> (i32, i32) {
    %c0_i32 = arith.constant 0 : i32
    %c0_i32_0 = arith.constant 0 : i32
    %c0_i32_1 = arith.constant 0 : i32
    return %c0_i32, %c0_i32_0 : i32, i32
  }
  func.func @transform_2(%arg0: i32, %arg1: i32) -> (i32, i32, i32) {
    %c0_i32 = arith.constant 0 : i32
    %c0_i32_0 = arith.constant 0 : i32
    %c0_i32_1 = arith.constant 0 : i32
    return %arg0, %c0_i32, %c0_i32_0 : i32, i32, i32
  }
  func.func @transform_3(%arg0: i32, %arg1: i32) -> (i32, i32, i32) {
    %c0_i32 = arith.constant 0 : i32
    %c0_i32_0 = arith.constant 0 : i32
    %c0_i32_1 = arith.constant 0 : i32
    return %arg0, %c0_i32, %c0_i32_0 : i32, i32, i32
  }
}

</mosaic_0001>

<bundles_post_ra>
// kernel: tpu_custom_call.1
= control target key start
LH: loop header
LB: loop body
LE: loop exit
PB: predicated region body
PF: predicated region fallthrough
CT: control target
= control target key end

     0   :  { %9 = vsyncpa [#allocation3], 0  ;;  %s676_s0 = inlined_call_operand.hbm [shape: f32[2,4,256], index: 0, kind: input, shape index: {}]   ;;  %s677_s1 = inlined_call_operand.vmem [shape: f32[8,4], index: 1, kind: input, shape index: {}]   ;;  %s678_s2 = inlined_call_operand.vmem [shape: f32[2,8,1], index: 2, kind: output, shape index: {0}]   ;;  %s679_s3 = inlined_call_operand.vmem [shape: f32[2,8,1], index: 3, kind: output, shape index: {1}]  }
   0x1   :  { %11 = vsyncpa [#allocation3 + $0x1], 0  ;;  %s578_s12 = smov 0   ;;  %s580_s13 = smov 0  }
   0x2   :  { %s582_s14 = smov 0   ;;  %s584_s15 = smov 0  }
   0x3   :  { %s586_s16 = smov 0   ;;  %s588_s17 = smov 0  }
   0x4 LB: > { %s401_s18 = sadd.s32 4294967295, %s555_s17   ;;  %s29_s19 = sadd.s32 1, %s551_s16  ;;  %s555_s17 = sphi %s588_s17, %s17_s17   ;;  %s551_s16 = sphi %s586_s16, %s686_s16   ;;  %s547_s15 = sphi %s584_s15, %s685_s15   ;;  %s543_s14 = sphi %s582_s14, %s684_s14   ;;  %s539_s13 = sphi %s580_s13, %s683_s13   ;;  %s535_s12 = sphi %s578_s12, %s682_s12  }
   0x5   : > { %p31_p0 = scmp.ge.s32.totalorder %s29_s19, 2  ;;  %s38_s20 = sadd.s32 1, %s543_s14 }
   0x6   : > { %p45_p1 = scmp.ne.s32.totalorder %s543_s14, %s539_s13  ;;  %p46_p2 = scmp.eq.s32.totalorder %s555_s17, 0 }
   0x7   : > { %s688_s19 = smov (%p31_p0, %s29_s19), 0  ;;  %p51_p4 = scmp.ne.s32.totalorder %s539_s13, %s535_s12 }
   0x8   : > { %p614_p3 = por %p46_p2, %p45_p1  ;;  %s33_s22 = ssub.s32 %s551_s16, %s688_s19 }
   0x9   : > { %p52_p5 = scmp.eq.s32.totalorder %s401_s18, 0  ;;  %p36_p6 = scmp.eq.s32.totalorder %s33_s22, 0 }
   0xa   : > { %p425_p8 = scmp.lt.s32.totalorder %s555_s17, 2  ;;  %s151_s25 = sand.u32 1, %s543_s14  }
   0xb   : > { %p621_p7 = por %p52_p5, %p51_p4  ;;  %s418_s26 = sshll.u32 %s551_s16, 3 }
   0xc   : > { %s627_s24 = scalar_select %p36_p6, %s543_s14, %s38_s20  }
   0xd   : > { %s405_s27 = sshll.u32 %s151_s25, 3  ;;  %s162_s30 = scalar_lea.hbm %s676_s0, %s418_s26 }
   0xe   : > { %s164_s4 = sshll.u32 %s162_s30, 4  ;;  %s155_s5 = scalar_lea.vmem [#allocation2], %s405_s27  ;;  %s165_s4 = int_to_ptr.hbm [resolvable:$true] %s164_s4 }
   0xf   : > { %s166_s6 = sshll.u32 %s155_s5, 4  ;;  %p422_p9 = pnand %p425_p8, %p614_p3  ;;  %s167_s6 = int_to_ptr.vmem [resolvable:$true] %s166_s6 }
  0x10   : > { %p408_p10 = scmp.ge.s32.totalorder %s555_s17, 1  ;;  %p171_p11 = scmp.lt.s32.totalorder %s555_s17, 3 }
  0x11   : > { %s152_s7 = scalar_lea.sflag [#allocation3], %s151_s25 }
  0x12   : > { %424 = dma.hbm_to_vmem [thread:$0]  (!%p422_p9), %s165_s4, 128, %s167_s6, %s152_s7  }
  0x13   : > { %p172_p12 = pnand %p408_p10, %p171_p11 }
  0x14   : > { %s177_s8 = sand.u32 (!%p172_p12), 1, %s539_s13  }
  0x15   : > { %175 = sbr.rel (%p172_p12) target bundleno = 292 (0x124), region = 28  ;;  %s409_s9 = sshll.u32 (!%p172_p12), %s177_s8, 3 }
  0x16   : > { %s178_s10 = scalar_lea.sflag (!%p172_p12), [#allocation3], %s177_s8  ;;  %s181_s11 = scalar_lea.vmem (!%p172_p12), [#allocation2], %s409_s9 }
  0x1a   : > { %530 = dma.done.wait (%p621_p7), %s178_s10, 128  }
  0x1b   : > { %532 = vsyncadd (%p621_p7), %s178_s10, 4294967168  ;;  %v225_v0 = vld [vmem:[%s181_s11] sm:$0xff]  ;;  %vm234_vm0 = vcmask 1043456   ;;  %v224_v1 = vld [vmem:[%s677_s1] sm:$0xff]  ;;  %vm230_vm1 = vcmask 31744   ;;  %p209_p13 = scmp.lt.s32.totalorder %s547_s15, 1 }
  0x1c   : > { %227 = vst [vmem:[#allocation1] ss:$2 sm:$0xff] %v225_v0  ;;  %vm221_vm2 = vcmask 7168   ;;  %v557_v4 = vmov 0.0  }
  0x1d   : > { %s690_s15 = smov (!%p209_p13, %s547_s15), 1 }
  0x1e   : > { %s410_s20 = sshll.u32 %s690_s15, 3 }
  0x1f   : > { %s212_s23 = scalar_lea.vmem %s678_s2, %s410_s20  ;;  %s216_s27 = scalar_lea.vmem %s679_s3, %s410_s20 }
  0x20   : > { %222 = vst.msk [vmem:[%s212_s23] sm:$0xff] %vm221_vm2, %v557_v4 }
  0x21   : > { %223 = vst.msk [vmem:[%s216_s27] sm:$0xff] %vm221_vm2, %v557_v4 }
  0x23   : > { %v228_v2 = vld.sshfl [vmem:[#allocation1] sm:$0xff pattern:$0x75316420]  ;;  %v229_v3 = vld.sshfl [vmem:[#allocation1 + $0x8] sm:$0xff pattern:$0x75316420] }
  0x24   : > { %412 = vmatpush.msk.msra.mxu0 %vm234_vm0, %v228_v2  ;;  %414 = vmatpush.msk.msra.mxu1 %vm234_vm0, %v229_v3 }
  0x25   : > { %413 = vmatmul.msk.f32.vlgmr.msra.gmra.mxu0 %vm230_vm1, %v224_v1  ;;  %415 = vmatmul.msk.f32.vlgmr.msra.gmra.mxu1 %vm230_vm1, %v224_v1 }
  0x27   : > { %v279_v11 = vld [vmem:[%s212_s23] sm:$0xff] }
  0x28   : > { %v286_v14 = vld [vmem:[%s216_s27] sm:$0xff] }
  0xa2   : > { %v256_v5 = vpop.f32.mrf.mxu0  ;;  %v276_v6 = vpop.f32.mrf.mxu1 }
  0xa3   : > { %v280_v7 = vadd.f32 %v276_v6, %v256_v5  ;;  %v287_v8 = vmul.f32 %v256_v5, %v256_v5  ;;  %v288_v9 = vmul.f32 %v276_v6, %v276_v6 }
  0xa5   : > { %281 = vadd.xlane.f32.xlu0 %v280_v7  ;;  %v289_v10 = vadd.f32 %v288_v9, %v287_v8 }
  0xad   : > { %290 = vadd.xlane.f32.xlu0 %v289_v10 }
 0x118   : > { %v282_v12 = vpop.xlane.xlu0 %281 }
 0x119   : > { %v283_v13 = vadd.f32 %v282_v12, %v279_v11 }
 0x11b   : > { %285 = vst.msk [vmem:[%s212_s23] sm:$0xff] %vm221_vm2, %v283_v13 }
 0x120   : > { %v291_v15 = vpop.xlane.xlu0 %290 }
 0x121   : > { %v292_v16 = vadd.f32 %v291_v15, %v286_v14 }
 0x123   : > { %293 = vst.msk [vmem:[%s216_s27] sm:$0xff] %vm221_vm2, %v292_v16 }
 0x124 PF: > { %s17_s17 = sadd.s32 1, %s555_s17   ;;  %s682_s12 = smov %s539_s13 }
 0x125   : > { %p14_p0 = scmp.ge.s32.totalorder %s17_s17, 4   ;;  %s683_s13 = smov %s543_s14 }
 0x126   : > { %s684_s14 = smov %s627_s24  ;;  %s685_s15 = smov %s551_s16 }
 0x127   : > { %s686_s16 = smov %s688_s19  ;;  %16 = sbr.rel (!%p14_p0) target bundleno = 4 (0x4), region = 84 }
 0x12c   :  { %327 = vsyncpa [#allocation3], 1 }
 0x12d   :  { %329 = vsyncpa [#allocation3 + $0x1], 1 }

</bundles_post_ra>
